<compile_context>
chip_gen: v7x
topology: tpu7x:2x2x1
jax: 0.10.0
libtpu: 0.0.40
codegen_flags: <defaults>
</compile_context>

<pallas_src>
import math
import functools

import jax
import jax.numpy as jnp
from jax.experimental import pallas as pl
from jax.experimental.pallas import tpu as pltpu


def _embed_gather_kernel(ids_ref, table_hbm, out_ref, rows_vmem, sem, *,
                         scale: float, tb: int):
    """Gather `tb` embedding rows via per-row DMA and scale by sqrt(d_model).

    ids_ref:   (N_pad,) int32 in SMEM (scalar-prefetched flat token ids)
    table_hbm: (V, D) table ref in HBM (memory_space=pl.ANY, no auto-DMA)
    out_ref:   (TB, D) output block in VMEM
    rows_vmem: (TB, D) VMEM scratch receiving the gathered rows
    sem:       (TB,) DMA semaphores, one per row copy
    """
    blk = pl.program_id(0)
    base = blk * tb

    # Issue one row DMA per token: HBM table[ids[base + t]] -> VMEM rows[t].
    @pl.loop(0, tb)
    def _issue(t):
        tok = ids_ref[base + t]
        pltpu.make_async_copy(table_hbm.at[tok], rows_vmem.at[t], sem.at[t]).start()

    # Wait for all row DMAs of this block (descriptor index is irrelevant for
    # the wait; only shape/semaphore matter).
    @pl.loop(0, tb)
    def _wait(t):
        pltpu.make_async_copy(table_hbm.at[0], rows_vmem.at[t], sem.at[t]).wait()

    # Fuse the sqrt(d_model) scaling with the store to the output block.
    out_ref[...] = (rows_vmem[...] * scale).astype(out_ref.dtype)


def input_embeddings(token_ids: jax.Array, table: jax.Array,
                     *, block_tokens: int = 128) -> jax.Array:
    """token_ids: (B, S) int32, table: (V, D) float32 -> (B, S, D) float32."""
    b, s = token_ids.shape
    v, d = table.shape
    n = b * s
    scale = math.sqrt(float(d))

    def _round_up(x, m):
        return ((x + m - 1) // m) * m

    # Token-block size: multiple of 8 (sublane), big enough to amortize the
    # ~0.35us per-grid-step overhead, but no larger than the (padded) problem.
    tb = min(block_tokens, _round_up(n, 8))
    n_pad = _round_up(n, tb)
    grid = (n_pad // tb,)

    # Flatten ids; clamp to valid range (OOB policy: clamp, documented above);
    # pad the tail with token 0 (padded rows are discarded in the wrapper).
    flat_ids = jnp.clip(token_ids.reshape(n).astype(jnp.int32), 0, v - 1)
    if n_pad != n:
        flat_ids = jnp.pad(flat_ids, (0, n_pad - n))

    itemsize = jnp.dtype(table.dtype).itemsize
    cost = pl.CostEstimate(
        flops=int(n_pad * d),                                   # scale multiply only
        transcendentals=0,
        bytes_accessed=int(2 * n_pad * d * itemsize + n_pad * 4),  # rows in + out + ids
    )

    out_flat = pl.pallas_call(
        functools.partial(_embed_gather_kernel, scale=scale, tb=tb),
        out_shape=jax.ShapeDtypeStruct((n_pad, d), table.dtype),
        grid_spec=pltpu.PrefetchScalarGridSpec(
            num_scalar_prefetch=1,                     # flat ids -> SMEM
            grid=grid,
            in_specs=[
                pl.BlockSpec(memory_space=pl.ANY),     # table stays in HBM
            ],
            out_specs=pl.BlockSpec((tb, d), lambda i, ids: (i, 0)),
            scratch_shapes=[
                pltpu.VMEM((tb, d), table.dtype),      # gathered rows
                pltpu.SemaphoreType.DMA((tb,)),        # one sem per row DMA
            ],
        ),
        compiler_params=pltpu.CompilerParams(
            dimension_semantics=("parallel",),         # token blocks are independent
        ),
        cost_estimate=cost,
    )(flat_ids, table)

    return out_flat[:n].reshape(b, s, d)


if __name__ == "__main__":
    # Small shapes consistent with the module: d_model=32, vocab_size=64,
    # input token ids of shape (batch=2, seq=8).
    d_model = 32
    vocab_size = 64
    batch, seq = 2, 8

    key = jax.random.PRNGKey(0)
    k_table, k_ids = jax.random.split(key)

    # nn.Embedding default init: N(0, 1)
    table = jax.random.normal(k_table, (vocab_size, d_model), dtype=jnp.float32)
    token_ids = jax.random.randint(k_ids, (batch, seq), 0, vocab_size, dtype=jnp.int32)

    out = input_embeddings(token_ids, table)
    jax.block_until_ready(out)

    # Reference check (plain JAX gather + scale).
    ref = jnp.take(table, token_ids, axis=0) * math.sqrt(d_model)
    assert out.shape == (batch, seq, d_model)
    assert jnp.allclose(out, ref, atol=1e-5, rtol=1e-5)

    print("KERNEL_OK")
</pallas_src>

<mosaic_0001>
module attributes {stable_mosaic.version = 11 : i64} {
  func.func @_embed_gather_kernel(%arg0: i32, %arg1: memref<16xi32, #tpu.memory_space<smem>>, %arg2: memref<64x32xf32, #tpu.memory_space<any>>, %arg3: memref<16x32xf32, #tpu.memory_space<vmem>>, %arg4: memref<16x32xf32, #tpu.memory_space<vmem>>, %arg5: memref<16x!tpu.dma_semaphore, #tpu.memory_space<semaphore_mem>>) attributes {dimension_semantics = [#tpu.dimension_semantics<parallel>], iteration_bounds = array<i64: 1>, scalar_prefetch = 1 : i64, scratch_operands = 2 : i64, tpu.core_type = #tpu.core_type<tc>, window_params = [{}, {transform_indices = @transform_1, window_bounds = array<i64: 16, 32>}]} {
    %c16_i32 = arith.constant 16 : i32
    %0 = arith.muli %arg0, %c16_i32 : i32
    %c0_i32 = arith.constant 0 : i32
    %c16_i32_0 = arith.constant 16 : i32
    %1 = arith.addi %c0_i32, %c16_i32_0 : i32
    %c1_i32 = arith.constant 1 : i32
    scf.for %arg6 = %c0_i32 to %1 step %c1_i32  : i32 {
      %c1_i32_9 = arith.constant 1 : i32
      %7 = arith.muli %arg6, %c1_i32_9 : i32
      %c0_i32_10 = arith.constant 0 : i32
      %8 = arith.addi %c0_i32_10, %7 : i32
      %9 = arith.addi %0, %8 : i32
      %10 = arith.index_cast %9 : i32 to index
      %11 = memref.load %arg1[%10] : memref<16xi32, #tpu.memory_space<smem>>
      %c0_i32_11 = arith.constant 0 : i32
      %12 = tpu.memref_slice %arg2[%11, %c0_i32_11] : memref<64x32xf32, #tpu.memory_space<any>> -> memref<1x32xf32, #tpu.memory_space<any>>
      %13 = tpu.memref_squeeze %12 : memref<1x32xf32, #tpu.memory_space<any>> -> memref<32xf32, #tpu.memory_space<any>>
      %c0_i32_12 = arith.constant 0 : i32
      %14 = tpu.memref_slice %arg4[%8, %c0_i32_12] : memref<16x32xf32, #tpu.memory_space<vmem>> -> memref<1x32xf32, #tpu.memory_space<vmem>>
      %15 = tpu.memref_squeeze %14 : memref<1x32xf32, #tpu.memory_space<vmem>> -> memref<32xf32, #tpu.memory_space<vmem>>
      %16 = tpu.memref_slice %arg5[%8] : memref<16x!tpu.dma_semaphore, #tpu.memory_space<semaphore_mem>> -> memref<1x!tpu.dma_semaphore, #tpu.memory_space<semaphore_mem>>
      %17 = tpu.memref_squeeze %16 : memref<1x!tpu.dma_semaphore, #tpu.memory_space<semaphore_mem>> -> memref<!tpu.dma_semaphore, #tpu.memory_space<semaphore_mem>>
      tpu.enqueue_dma source(%13 : memref<32xf32, #tpu.memory_space<any>>) target(%15 : memref<32xf32, #tpu.memory_space<vmem>>) target_semaphore(%17 : memref<!tpu.dma_semaphore, #tpu.memory_space<semaphore_mem>>)
    }
    %c16_i32_1 = arith.constant 16 : i32
    %c0_i32_2 = arith.constant 0 : i32
    %c16_i32_3 = arith.constant 16 : i32
    %2 = arith.addi %c0_i32_2, %c16_i32_3 : i32
    %c1_i32_4 = arith.constant 1 : i32
    scf.for %arg6 = %c0_i32_2 to %2 step %c1_i32_4  : i32 {
      %c1_i32_9 = arith.constant 1 : i32
      %7 = arith.muli %arg6, %c1_i32_9 : i32
      %c0_i32_10 = arith.constant 0 : i32
      %8 = arith.addi %c0_i32_10, %7 : i32
      %c0_i32_11 = arith.constant 0 : i32
      %c0_i32_12 = arith.constant 0 : i32
      %9 = tpu.memref_slice %arg2[%c0_i32_11, %c0_i32_12] : memref<64x32xf32, #tpu.memory_space<any>> -> memref<1x32xf32, #tpu.memory_space<any>>
      %10 = tpu.memref_squeeze %9 : memref<1x32xf32, #tpu.memory_space<any>> -> memref<32xf32, #tpu.memory_space<any>>
      %c0_i32_13 = arith.constant 0 : i32
      %11 = tpu.memref_slice %arg4[%8, %c0_i32_13] : memref<16x32xf32, #tpu.memory_space<vmem>> -> memref<1x32xf32, #tpu.memory_space<vmem>>
      %12 = tpu.memref_squeeze %11 : memref<1x32xf32, #tpu.memory_space<vmem>> -> memref<32xf32, #tpu.memory_space<vmem>>
      %13 = tpu.memref_slice %arg5[%8] : memref<16x!tpu.dma_semaphore, #tpu.memory_space<semaphore_mem>> -> memref<1x!tpu.dma_semaphore, #tpu.memory_space<semaphore_mem>>
      %14 = tpu.memref_squeeze %13 : memref<1x!tpu.dma_semaphore, #tpu.memory_space<semaphore_mem>> -> memref<!tpu.dma_semaphore, #tpu.memory_space<semaphore_mem>>
      tpu.wait_dma2 semaphore(%14 : memref<!tpu.dma_semaphore, #tpu.memory_space<semaphore_mem>>) src(%10 : memref<32xf32, #tpu.memory_space<any>>) dst(%12 : memref<32xf32, #tpu.memory_space<vmem>>)
    }
    %c16_i32_5 = arith.constant 16 : i32
    %c0 = arith.constant 0 : index
    %c0_6 = arith.constant 0 : index
    %3 = vector.load %arg4[%c0, %c0_6] : memref<16x32xf32, #tpu.memory_space<vmem>>, vector<16x32xf32>
    %cst = arith.constant 5.65685415 : f32
    %4 = vector.broadcast %cst : f32 to vector<16x32xf32>
    %5 = arith.mulf %3, %4 : vector<16x32xf32>
    %c0_7 = arith.constant 0 : index
    %c0_8 = arith.constant 0 : index
    %6 = vector.load %arg3[%c0_7, %c0_8] : memref<16x32xf32, #tpu.memory_space<vmem>>, vector<16x32xf32>
    tpu.vector_store %arg3[%c0_7, %c0_8], %5 {strides = array<i32>} : memref<16x32xf32, #tpu.memory_space<vmem>>, vector<16x32xf32>,
    return
  }
  func.func @transform_1(%arg0: i32, %arg1: memref<16xi32, #tpu.memory_space<smem>>) -> (i32, i32) {
    %c0_i32 = arith.constant 0 : i32
    %c0_i32_0 = arith.constant 0 : i32
    return %arg0, %c0_i32 : i32, i32
  }
}

</mosaic_0001>

<bundles_post_ra>
// kernel: tpu_custom_call.1
= control target key start
LH: loop header
LB: loop body
LE: loop exit
PB: predicated region body
PF: predicated region fallthrough
CT: control target
= control target key end

     0   :  { %s366_s0 = inlined_call_operand.vmem [shape: s32[16], index: 0, kind: input, shape index: {}]   ;;  %s367_s1 = inlined_call_operand.vmem [shape: f32[64,32], index: 1, kind: input, shape index: {}]   ;;  %s368_s2 = inlined_call_operand.hbm [shape: f32[16,32], index: 2, kind: output, shape index: {}]  }
   0x1   :  { %s7_s11 = sshll.u32 %s366_s0, 4  ;;  %s8_s11 = int_to_ptr.vmem [resolvable:$true] %s7_s11 }
   0x2   :  { %s273_s12 = scalar_lea.vmem %s8_s11, 16  ;;  %p278_p1 = scmp.lt.s32.totalorder %s8_s11, %s8_s11 }
   0x3   :  { %p274_p0 = scmp.ne.s32.totalorder %s8_s11, %s273_s12  ;;  %p279_p2 = scmp.lt.s32.totalorder %s273_s12, %s273_s12 }
   0x5   :  { %p280_p3 = por %p279_p2, %p278_p1 }
   0x7   :  { %p281_p4 = pnand %p280_p3, %p274_p0 }
   0x9   :  { %284 = shalt.err (!%p281_p4)  }
   0xa   :  { %s329_s13 = smov [#allocation5]  }
   0xb   :  { %10 = dma.vmem_to_smem %s8_s11, 16, %s329_s13, [#allocation4] }
   0xc   :  { %315 = dma.done.wait [#allocation4], 16 }
   0xd   :  { %316 = vsyncadd [#allocation4], 4294967280 }
   0xe   :  { %12 = sfence }
   0xf   :  { %13 = vsyncpa [#allocation7], 0  ;;  %s321_s14 = smov 0  }
  0x10 LB: > { %s22_s15 = sld [smem:[#allocation5 + %s323_s14]]  ;;  %s24_s18 = scalar_lea.vmem [#allocation2], %s323_s14  ;;  %s323_s14 = sphi %s321_s14, %s20_s14  }
  0x11   : > { %s25_s19 = scalar_lea.sflag [#allocation3], %s323_s14 }
  0x16   : > { %s23_s17 = scalar_lea.vmem %s367_s1, %s22_s15 }
  0x17   : > { %v43_v0 = vld [vmem:[%s23_s17] sm:$0x1] }
  0x18   : > { %44 = vst [vmem:[%s24_s18] sm:$0x1] %v43_v0 }
  0x19   : > { %69 = vsyncadd %s25_s19, 16  ;;  %s20_s14 = sadd.s32 1, %s323_s14  }
  0x1a   : > { %p17_p5 = scmp.ge.s32.totalorder %s20_s14, 16  }
  0x1b   :  { %s325_s20 = smov (%p17_p5), 0  }
  0x1c   :  { %19 = sbr.rel (!%p17_p5) target bundleno = 16 (0x10), region = 93 }
  0x23 LB: > { %s76_s21 = scalar_lea.sflag [#allocation3], %s327_s20  ;;  %s327_s20 = sphi %s325_s20, %s75_s20  }
  0x24   : > { %317 = dma.done.wait %s76_s21, 16 }
  0x25   : > { %318 = vsyncadd %s76_s21, 4294967280  ;;  %s75_s20 = sadd.s32 1, %s327_s20  }
  0x26   : > { %p72_p6 = scmp.ge.s32.totalorder %s75_s20, 16  }
  0x27   :  { %v79_v1 = vld [vmem:[#allocation2] sm:$0xff] (%p72_p6)  ;;  %vm83_vm0 = vcmask (%p72_p6), 261120   ;;  %v80_v2 = vld [vmem:[#allocation2 + $0x8] sm:$0xff] (%p72_p6)  ;;  %s330_s22 = smov (%p72_p6), [#allocation6]  }
  0x28   :  { %74 = sbr.rel (!%p72_p6) target bundleno = 35 (0x23), region = 104  ;;  %v81_v3 = vmul.f32 (%p72_p6), 5.656854, %v79_v1  ;;  %v82_v4 = vmul.f32 (%p72_p6), 5.656854, %v80_v2  ;;  %s91_s23 = sshll.u32 (%p72_p6), %s330_s22, 4  ;;  %s92_s23 = int_to_ptr.vmem [resolvable:$true] %s91_s23 }
  0x29   :  { %s285_s1 = scalar_lea.vmem (%p72_p6), %s92_s23, 256  ;;  %p290_p8 = scmp.lt.s32.totalorder (%p72_p6), %s92_s23, %s92_s23 }
  0x2a   :  { %84 = vst.msk [vmem:[#allocation6] sm:$0xff] (%p72_p6), %vm83_vm0, %v81_v3  ;;  %85 = vst.msk [vmem:[#allocation6 + $0x8] sm:$0xff] (%p72_p6), %vm83_vm0, %v82_v4  ;;  %p286_p7 = scmp.ne.s32.totalorder (%p72_p6), %s92_s23, %s285_s1  ;;  %p291_p9 = scmp.lt.s32.totalorder (%p72_p6), %s285_s1, %s285_s1 }
  0x2c   :  { %p292_p10 = por (%p72_p6), %p291_p9, %p290_p8 }
  0x2e   :  { %p293_p11 = pnand (%p72_p6), %p292_p10, %p286_p7 }
  0x30   :  { %296 = shalt.err (!%p293_p11)
}
  0x31   :  { %s297_s26 = scalar_lea.hbm %s368_s2, 256 }
  0x32   :  { %p298_p12 = scmp.ne.s32.totalorder %s368_s2, %s297_s26  ;;  %p301_p13 = scmp.lt.u32.totalorder %s297_s26, %s368_s2 }
  0x34   :  { %p303_p0 = pnand %p301_p13, %p298_p12 }
  0x36   :  { %306 = shalt.err (!%p303_p0)
}
  0x37   :  { %s331_s3 = smov 128   ;;  %s332_s4 = smov 8  }
  0x38   :  { %97 = dma.vmem_to_hbm [thread:$0]  %s92_s23, 256, %s368_s2, [#allocation7], %s331_s3, %s331_s3, %s332_s4  }
  0x39   :  { %319 = dma.done.wait [#allocation7], 256  }
  0x3a   :  { %320 = vsyncadd [#allocation7], 4294967040 }
  0x3b   :  { %101 = vsyncpa [#allocation7], 1 }
  0x3c   :  { %102 = vsyncmov [#allocation3] }
  0x3f   :  { %s103_s7 = vpop.sfrf %102 }
  0x40   :  { %p237_p1 = scmp.ne.s32.totalorder %s103_s7, 0 }
  0x42   :  { %107 = shalt.err (%p237_p1)  }
  0x43   :  { %109 = vsyncmov [#allocation3 + $0x1] }
  0x46   :  { %s110_s8 = vpop.sfrf %109 }
  0x47   :  { %p238_p2 = scmp.ne.s32.totalorder %s110_s8, 0 }
  0x49   :  { %114 = shalt.err (%p238_p2)  }
  0x4a   :  { %116 = vsyncmov [#allocation3 + $0x2] }
  0x4d   :  { %s117_s9 = vpop.sfrf %116 }
  0x4e   :  { %p239_p3 = scmp.ne.s32.totalorder %s117_s9, 0 }
  0x50   :  { %121 = shalt.err (%p239_p3)  }
  0x51   :  { %123 = vsyncmov [#allocation3 + $0x3] }
  0x54   :  { %s124_s10 = vpop.sfrf %123 }
  0x55   :  { %p240_p4 = scmp.ne.s32.totalorder %s124_s10, 0 }
  0x57   :  { %128 = shalt.err (%p240_p4)  }
  0x58   :  { %130 = vsyncmov [#allocation3 + $0x4] }
  0x5b   :  { %s131_s2 = vpop.sfrf %130 }
  0x5c   :  { %p241_p5 = scmp.ne.s32.totalorder %s131_s2, 0 }
  0x5e   :  { %135 = shalt.err (%p241_p5)  }
  0x5f   :  { %137 = vsyncmov [#allocation3 + $0x5] }
  0x62   :  { %s138_s11 = vpop.sfrf %137 }
  0x63   :  { %p242_p6 = scmp.ne.s32.totalorder %s138_s11, 0 }
  0x65   :  { %142 = shalt.err (%p242_p6)  }
  0x66   :  { %144 = vsyncmov [#allocation3 + $0x6] }
  0x69   :  { %s145_s12 = vpop.sfrf %144 }
  0x6a   :  { %p243_p7 = scmp.ne.s32.totalorder %s145_s12, 0 }
  0x6c   :  { %149 = shalt.err (%p243_p7)  }
  0x6d   :  { %151 = vsyncmov [#allocation3 + $0x7] }
  0x70   :  { %s152_s13 = vpop.sfrf %151 }
  0x71   :  { %p244_p8 = scmp.ne.s32.totalorder %s152_s13, 0 }
  0x73   :  { %156 = shalt.err (%p244_p8)  }
  0x74   :  { %158 = vsyncmov [#allocation3 + $0x8] }
  0x77   :  { %s159_s14 = vpop.sfrf %158 }
  0x78   :  { %p245_p9 = scmp.ne.s32.totalorder %s159_s14, 0 }
  0x7a   :  { %163 = shalt.err (%p245_p9)  }
  0x7b   :  { %165 = vsyncmov [#allocation3 + $0x9] }
  0x7e   :  { %s166_s15 = vpop.sfrf %165 }
  0x7f   :  { %p246_p10 = scmp.ne.s32.totalorder %s166_s15, 0 }
  0x81   :  { %170 = shalt.err (%p246_p10)  }
  0x82   :  { %172 = vsyncmov [#allocation3 + $0xa] }
  0x85   :  { %s173_s0 = vpop.sfrf %172 }
  0x86   :  { %p247_p11 = scmp.ne.s32.totalorder %s173_s0, 0 }
  0x88   :  { %177 = shalt.err (%p247_p11)  }
  0x89   :  { %179 = vsyncmov [#allocation3 + $0xb] }
  0x8c   :  { %s180_s16 = vpop.sfrf %179 }
  0x8d   :  { %p248_p12 = scmp.ne.s32.totalorder %s180_s16, 0 }
  0x8f   :  { %184 = shalt.err (%p248_p12)  }
  0x90   :  { %186 = vsyncmov [#allocation3 + $0xc] }
  0x93   :  { %s187_s17 = vpop.sfrf %186 }
  0x94   :  { %p249_p13 = scmp.ne.s32.totalorder %s187_s17, 0 }
  0x96   :  { %191 = shalt.err (%p249_p13)  }
  0x97   :  { %193 = vsyncmov [#allocation3 + $0xd] }
  0x9a   :  { %s194_s18 = vpop.sfrf %193 }
  0x9b   :  { %p250_p0 = scmp.ne.s32.totalorder %s194_s18, 0 }
  0x9d   :  { %198 = shalt.err (%p250_p0)  }
  0x9e   :  { %200 = vsyncmov [#allocation3 + $0xe] }
  0xa1   :  { %s201_s19 = vpop.sfrf %200 }
  0xa2   :  { %p251_p1 = scmp.ne.s32.totalorder %s201_s19, 0 }
  0xa4   :  { %205 = shalt.err (%p251_p1)  }
  0xa5   :  { %207 = vsyncmov [#allocation3 + $0xf] }
  0xa8   :  { %s208_s20 = vpop.sfrf %207 }
  0xa9   :  { %p252_p2 = scmp.ne.s32.totalorder %s208_s20, 0 }
  0xab   :  { %212 = shalt.err (%p252_p2)  }

</bundles_post_ra>
